<compile_context>
chip_gen: v7x
topology: tpu7x:2x2x1
jax: 0.10.0
libtpu: 0.0.40
codegen_flags: <defaults>
</compile_context>

<pallas_src>
import jax
import jax.numpy as jnp
from jax.experimental import pallas as pl
from jax.experimental.pallas import tpu as pltpu

INPUT_SIZE = 4
OUTPUT_SIZE = 3
LANE = 128


def _round_up(x, m):
    return ((x + m - 1) // m) * m


def _linear_kernel(b_ref, wt_ref, xt_ref, ot_ref):
    # b_ref : SMEM (3,)    f32 bias
    # wt_ref: VMEM (4, 3)  f32 weight transposed (in, out)
    # xt_ref: VMEM (4, TB) input block, feature-major (batch on lanes)
    # ot_ref: VMEM (3, TB) output block, feature-major
    x = xt_ref[...].astype(jnp.float32)                      # (4, TB), full block
    for o in range(OUTPUT_SIZE):                             # fully unrolled (3)
        w_col = wt_ref[:, pl.ds(o, 1)]                       # (4, 1), lane-broadcast
        # Full-block VPU multiply + XLU sublane reduction (not per-row FMAs).
        acc = jnp.sum(x * w_col, axis=0, keepdims=True)      # (1, TB)
        ot_ref[pl.ds(o, 1), :] = (acc + b_ref[o]).astype(ot_ref.dtype)


def ann_linear_forward_feature_major(x_t, weight, bias, *, block_batch=128 * 1024):
    """Fast path.  x_t: (4, batch) feature-major -> y_t: (3, batch).

    Equivalent to (x_t.T @ weight.T + bias).T but with no layout copies.
    """
    in_f, batch = x_t.shape
    if in_f != INPUT_SIZE:
        raise ValueError(f"expected leading dim {INPUT_SIZE}, got {in_f}")

    # Lane-dense batch tile: multiple of 128, capped by the 128-rounded batch.
    tb = min(_round_up(block_batch, LANE), _round_up(batch, LANE))
    grid = (pl.cdiv(batch, tb),)

    wt = weight.astype(jnp.float32).T.reshape(INPUT_SIZE, OUTPUT_SIZE)   # (4, 3)
    b = bias.astype(jnp.float32).reshape(OUTPUT_SIZE)                    # (3,)

    itemsize = jnp.dtype(x_t.dtype).itemsize
    cost = pl.CostEstimate(
        flops=2 * batch * INPUT_SIZE * OUTPUT_SIZE,
        transcendentals=0,
        bytes_accessed=itemsize * batch * (INPUT_SIZE + OUTPUT_SIZE)
        + 4 * (INPUT_SIZE * OUTPUT_SIZE + OUTPUT_SIZE),
    )

    # Double-buffered in/out tiles (sublane-padded 4->8 and 3->8), plus slack.
    tile_bytes = 2 * (2 * 8 * tb * 4)
    vmem_limit = int(min(max(tile_bytes + (2 << 20), 32 << 20), 48 << 20))

    return pl.pallas_call(
        _linear_kernel,
        out_shape=jax.ShapeDtypeStruct((OUTPUT_SIZE, batch), x_t.dtype),
        grid=grid,
        in_specs=[
            pl.BlockSpec(memory_space=pltpu.MemorySpace.SMEM),           # bias (3,)
            pl.BlockSpec((INPUT_SIZE, OUTPUT_SIZE), lambda i: (0, 0)),   # weight.T (4,3)
            pl.BlockSpec((INPUT_SIZE, tb), lambda i: (0, i)),            # x_t tile
        ],
        out_specs=pl.BlockSpec((OUTPUT_SIZE, tb), lambda i: (0, i)),
        compiler_params=pltpu.CompilerParams(
            dimension_semantics=("parallel",),
            vmem_limit_bytes=vmem_limit,
        ),
        cost_estimate=cost,
    )(b, wt, x_t)


def ann_linear_forward(x, weight, bias, *, block_batch=128 * 1024):
    """PyTorch nn.Linear semantics: y = x @ weight.T + bias, (B,4) -> (B,3).

    Convenience wrapper only: it transposes at the API boundary (extra XLA
    layout passes).  Prefer `ann_linear_forward_feature_major` when the
    producer / consumer can work with feature-major (4,B)/(3,B) tensors.
    """
    y_t = ann_linear_forward_feature_major(
        jnp.transpose(x), weight, bias, block_batch=block_batch
    )
    return jnp.transpose(y_t)


def init_params(key):
    """Deterministic init mimicking nn.Linear default: U(-1/sqrt(in), 1/sqrt(in))."""
    kw, kb = jax.random.split(key)
    bound = 1.0 / jnp.sqrt(jnp.float32(INPUT_SIZE))
    weight = jax.random.uniform(
        kw, (OUTPUT_SIZE, INPUT_SIZE), dtype=jnp.float32, minval=-bound, maxval=bound
    )
    bias = jax.random.uniform(
        kb, (OUTPUT_SIZE,), dtype=jnp.float32, minval=-bound, maxval=bound
    )
    return weight, bias


if __name__ == "__main__":
    key = jax.random.PRNGKey(0)
    kx, kp = jax.random.split(key)

    weight, bias = init_params(kp)

    # Small batch through the feature-major fast path (single padded tile).
    batch = 8
    x = jax.random.normal(kx, (batch, INPUT_SIZE), dtype=jnp.float32)
    y_t = ann_linear_forward_feature_major(jnp.transpose(x), weight, bias)
    jax.block_until_ready(y_t)
    y_ref = x @ weight.T + bias
    assert y_t.shape == (OUTPUT_SIZE, batch)
    assert jnp.allclose(y_t.T, y_ref, atol=1e-5, rtol=1e-5)

    # Non-multiple-of-128 batch: multiple pipelined grid steps and a masked
    # partial edge block, via the PyTorch-layout convenience wrapper.
    batch2 = 300
    x2 = jax.random.normal(kx, (batch2, INPUT_SIZE), dtype=jnp.float32)
    y2 = ann_linear_forward(x2, weight, bias, block_batch=128)
    jax.block_until_ready(y2)
    y2_ref = x2 @ weight.T + bias
    assert y2.shape == (batch2, OUTPUT_SIZE)
    assert jnp.allclose(y2, y2_ref, atol=1e-5, rtol=1e-5)

    print("KERNEL_OK")
</pallas_src>

<mosaic_0001>
module attributes {stable_mosaic.version = 11 : i64} {
  func.func @_linear_kernel(%arg0: i32, %arg1: memref<3xf32, #tpu.memory_space<smem>>, %arg2: memref<4x3xf32, #tpu.memory_space<vmem>>, %arg3: memref<4x128xf32, #tpu.memory_space<vmem>>, %arg4: memref<3x128xf32, #tpu.memory_space<vmem>>) attributes {dimension_semantics = [#tpu.dimension_semantics<parallel>], iteration_bounds = array<i64: 1>, scalar_prefetch = 0 : i64, scratch_operands = 0 : i64, tpu.core_type = #tpu.core_type<tc>, window_params = [{transform_indices = @transform_0, window_bounds = array<i64: 3>}, {pipeline_mode = #tpu.pipeline_mode<synchronous>, transform_indices = @transform_1, window_bounds = array<i64: 4, 3>}, {transform_indices = @transform_2, window_bounds = array<i64: 4, 128>}, {transform_indices = @transform_3, window_bounds = array<i64: 3, 128>}]} {
    %c0 = arith.constant 0 : index
    %c0_0 = arith.constant 0 : index
    %0 = vector.load %arg3[%c0, %c0_0] : memref<4x128xf32, #tpu.memory_space<vmem>>, vector<4x128xf32>
    %c0_1 = arith.constant 0 : index
    %c0_2 = arith.constant 0 : index
    %1 = vector.load %arg2[%c0_1, %c0_2] : memref<4x3xf32, #tpu.memory_space<vmem>>, vector<4x1xf32>
    %2 = vector.broadcast %1 : vector<4x1xf32> to vector<4x128xf32>
    %3 = arith.mulf %0, %2 : vector<4x128xf32>
    %cst = arith.constant dense<0.000000e+00> : vector<128xf32>
    %4 = vector.multi_reduction <add>, %3, %cst [0] : vector<4x128xf32> to vector<128xf32>
    %5 = vector.shape_cast %4 : vector<128xf32> to vector<1x128xf32>
    %c0_3 = arith.constant 0 : index
    %6 = memref.load %arg1[%c0_3] : memref<3xf32, #tpu.memory_space<smem>>
    %7 = vector.broadcast %6 : f32 to vector<1x128xf32>
    %8 = arith.addf %5, %7 : vector<1x128xf32>
    %c0_4 = arith.constant 0 : index
    %c0_5 = arith.constant 0 : index
    %9 = vector.load %arg4[%c0_4, %c0_5] : memref<3x128xf32, #tpu.memory_space<vmem>>, vector<1x128xf32>
    tpu.vector_store %arg4[%c0_4, %c0_5], %8 {strides = array<i32>} : memref<3x128xf32, #tpu.memory_space<vmem>>, vector<1x128xf32>,
    %c0_6 = arith.constant 0 : index
    %c1 = arith.constant 1 : index
    %10 = vector.load %arg2[%c0_6, %c1] : memref<4x3xf32, #tpu.memory_space<vmem>>, vector<4x1xf32>
    %11 = vector.broadcast %10 : vector<4x1xf32> to vector<4x128xf32>
    %12 = arith.mulf %0, %11 : vector<4x128xf32>
    %cst_7 = arith.constant dense<0.000000e+00> : vector<128xf32>
    %13 = vector.multi_reduction <add>, %12, %cst_7 [0] : vector<4x128xf32> to vector<128xf32>
    %14 = vector.shape_cast %13 : vector<128xf32> to vector<1x128xf32>
    %c1_8 = arith.constant 1 : index
    %15 = memref.load %arg1[%c1_8] : memref<3xf32, #tpu.memory_space<smem>>
    %16 = vector.broadcast %15 : f32 to vector<1x128xf32>
    %17 = arith.addf %14, %16 : vector<1x128xf32>
    %c1_9 = arith.constant 1 : index
    %c0_10 = arith.constant 0 : index
    %18 = vector.load %arg4[%c1_9, %c0_10] : memref<3x128xf32, #tpu.memory_space<vmem>>, vector<1x128xf32>
    tpu.vector_store %arg4[%c1_9, %c0_10], %17 {strides = array<i32>} : memref<3x128xf32, #tpu.memory_space<vmem>>, vector<1x128xf32>,
    %c0_11 = arith.constant 0 : index
    %c2 = arith.constant 2 : index
    %19 = vector.load %arg2[%c0_11, %c2] : memref<4x3xf32, #tpu.memory_space<vmem>>, vector<4x1xf32>
    %20 = vector.broadcast %19 : vector<4x1xf32> to vector<4x128xf32>
    %21 = arith.mulf %0, %20 : vector<4x128xf32>
    %cst_12 = arith.constant dense<0.000000e+00> : vector<128xf32>
    %22 = vector.multi_reduction <add>, %21, %cst_12 [0] : vector<4x128xf32> to vector<128xf32>
    %23 = vector.shape_cast %22 : vector<128xf32> to vector<1x128xf32>
    %c2_13 = arith.constant 2 : index
    %24 = memref.load %arg1[%c2_13] : memref<3xf32, #tpu.memory_space<smem>>
    %25 = vector.broadcast %24 : f32 to vector<1x128xf32>
    %26 = arith.addf %23, %25 : vector<1x128xf32>
    %c2_14 = arith.constant 2 : index
    %c0_15 = arith.constant 0 : index
    %27 = vector.load %arg4[%c2_14, %c0_15] : memref<3x128xf32, #tpu.memory_space<vmem>>, vector<1x128xf32>
    tpu.vector_store %arg4[%c2_14, %c0_15], %26 {strides = array<i32>} : memref<3x128xf32, #tpu.memory_space<vmem>>, vector<1x128xf32>,
    return
  }
  func.func @transform_0(%arg0: i32) -> i32 {
    %c0_i32 = arith.constant 0 : i32
    %c0_i32_0 = arith.constant 0 : i32
    return %c0_i32 : i32
  }
  func.func @transform_1(%arg0: i32) -> (i32, i32) {
    %c0_i32 = arith.constant 0 : i32
    %c0_i32_0 = arith.constant 0 : i32
    %c0_i32_1 = arith.constant 0 : i32
    return %c0_i32, %c0_i32_0 : i32, i32
  }
  func.func @transform_2(%arg0: i32) -> (i32, i32) {
    %c0_i32 = arith.constant 0 : i32
    %c0_i32_0 = arith.constant 0 : i32
    return %c0_i32, %arg0 : i32, i32
  }
  func.func @transform_3(%arg0: i32) -> (i32, i32) {
    %c0_i32 = arith.constant 0 : i32
    %c0_i32_0 = arith.constant 0 : i32
    return %c0_i32, %arg0 : i32, i32
  }
}

</mosaic_0001>

<bundles_post_ra>
// kernel: tpu_custom_call.1
= control target key start
LH: loop header
LB: loop body
LE: loop exit
PB: predicated region body
PF: predicated region fallthrough
CT: control target
= control target key end

     0   :  { %8 = vsyncpa [#allocation5], 0  ;;  %s250_s0 = inlined_call_operand.hbm [shape: f32[3], index: 0, kind: input, shape index: {}]   ;;  %s251_s1 = inlined_call_operand.hbm [shape: f32[4,3], index: 1, kind: input, shape index: {}]   ;;  %s252_s2 = inlined_call_operand.vmem [shape: f32[4,8], index: 2, kind: input, shape index: {}]   ;;  %s253_s3 = inlined_call_operand.hbm [shape: f32[3,8], index: 3, kind: output, shape index: {}]  }
   0x1   :  { %9 = vsyncpa [#allocation3], 0 }
   0x2   :  { %10 = vsyncpa [#allocation4], 0  ;;  %s122_s14 = scalar_lea.hbm %s250_s0, 16 }
   0x3   :  { %p123_p0 = scmp.ne.s32.totalorder %s250_s0, %s122_s14  ;;  %p126_p1 = scmp.lt.u32.totalorder %s122_s14, %s250_s0 }
   0x5   :  { %p128_p2 = pnand %p126_p1, %p123_p0 }
   0x7   :  { %131 = shalt.err (!%p128_p2)
}
   0x8   :  { %s182_s19 = smov [#allocation2]   ;;  %s183_s22 = smov [#allocation6]  }
   0x9   :  { %18 = dma.hbm_to_smem %s250_s0, 16, %s182_s19, [#allocation5]  }
   0xa   :  { %s25_s23 = sshll.u32 %s183_s22, 4  ;;  %s132_s26 = scalar_lea.hbm %s251_s1, 64  ;;  %s26_s23 = int_to_ptr.vmem [resolvable:$true] %s25_s23 }
   0xb   :  { %p133_p3 = scmp.ne.s32.totalorder %s251_s1, %s132_s26  ;;  %p136_p4 = scmp.lt.u32.totalorder %s132_s26, %s251_s1 }
   0xd   :  { %p138_p5 = pnand %p136_p4, %p133_p3 }
   0xf   :  { %141 = shalt.err (!%p138_p5)
}
  0x10   :  { %s142_s4 = scalar_lea.vmem %s26_s23, 64  ;;  %p147_p7 = scmp.lt.s32.totalorder %s26_s23, %s26_s23 }
  0x11   :  { %p143_p6 = scmp.ne.s32.totalorder %s26_s23, %s142_s4  ;;  %p148_p8 = scmp.lt.s32.totalorder %s142_s4, %s142_s4 }
  0x13   :  { %p149_p9 = por %p148_p8, %p147_p7 }
  0x15   :  { %p150_p10 = pnand %p149_p9, %p143_p6 }
  0x17   :  { %153 = shalt.err (!%p150_p10)
}
  0x18   :  { %28 = dma.hbm_to_vmem [thread:$0]  %s251_s1, 64, %s26_s23, [#allocation3]  }
  0x19   :  { %176 = dma.done.wait [#allocation5], 16  }
  0x1a   :  { %177 = vsyncadd [#allocation5], 4294967280 }
  0x1b   :  { %178 = dma.done.wait [#allocation3], 64  }
  0x1c   :  { %179 = vsyncadd [#allocation3], 4294967232 }
  0x1d   :  { %37 = sfence }
  0x1e   :  { %v76_v0 = vld [vmem:[#allocation6] sm:$0xf]  ;;  %v184_v2 = vmov 2   ;;  %v185_v3 = vmov 0   ;;  %v186_v5 = vmov 1   ;;  %vm46_vm0 = vcmask 1043456  }
  0x1f   :  { %v39_v1 = vld [vmem:[#allocation6] sm:$0xf]  ;;  %120 = vset.pattern.permute.xlu1 %v184_v2  ;;  %118 = vset.pattern.permute.xlu0 %v185_v3  ;;  %v38_v6 = vld [vmem:[%s252_s2] sm:$0xf]  ;;  %s54_s7 = sld [smem:[#allocation2]]  ;;  %s111_s8 = sld [smem:[#allocation2 + $0x2]] }
  0x20   :  { %79 = vperm.xlu1 %120, %v76_v0   ;;  %42 = vperm.xlu0 %118, %v39_v1   ;;  %v58_v4 = vld [vmem:[#allocation6] sm:$0xf]  ;;  %s110_s2 = sld [smem:[#allocation2 + $0x1]]  ;;  %s187_s9 = smov [#allocation7]  }
  0x21   :  { %s100_s10 = sshll.u32 %s187_s9, 4  ;;  %s101_s10 = int_to_ptr.vmem [resolvable:$true] %s100_s10 }
  0x22   :  { %s154_s11 = scalar_lea.vmem %s101_s10, 64  ;;  %p159_p12 = scmp.lt.s32.totalorder %s101_s10, %s101_s10 }
  0x23   :  { %p155_p11 = scmp.ne.s32.totalorder %s101_s10, %s154_s11  ;;  %p160_p13 = scmp.lt.s32.totalorder %s154_s11, %s154_s11 }
  0x24   :  { %119 = vset.pattern.permute.xlu0 %v186_v5 }
  0x25   :  { %61 = vperm.xlu0 %119, %v58_v4   ;;  %v55_v29 = vstv %s54_s7  ;;  %v91_v30 = vstv %s111_s8  ;;  %p161_p0 = por %p160_p13, %p159_p12 }
  0x26   :  { %v73_v37 = vstv %s110_s2 }
  0x27   :  { %p162_p1 = pnand %p161_p0, %p155_p11 }
  0x29   :  { %121 = vset.pattern.permute.xlu0 %v184_v2 }
  0x9f   :  { %v80_v7 = vpop.permute.xlu1 %79  ;;  %v43_v8 = vpop.permute.xlu0 %42 }
  0xa0   :  { %v82_v9 = vmul.f32 %v80_v7, %v38_v6  ;;  %v45_v10 = vmul.f32 %v43_v8, %v38_v6 }
  0xa2   :  { %v83_v11 = vsel %vm46_vm0, %v82_v9, 0.0  ;;  %v47_v12 = vsel %vm46_vm0, %v45_v10, 0.0 }
  0xa3   :  { %v84_v13 = vrot.slane %v83_v11, 4  ;;  %v48_v14 = vrot.slane %v47_v12, 4 }
  0xa4   :  { %v62_v15 = vpop.permute.xlu0 %61 }
  0xa5   :  { %v85_v16 = vadd.f32 %v84_v13, %v83_v11  ;;  %v49_v17 = vadd.f32 %v48_v14, %v47_v12  ;;  %v64_v18 = vmul.f32 %v62_v15, %v38_v6 }
  0xa7   :  { %v86_v19 = vrot.slane %v85_v16, 2  ;;  %v50_v20 = vrot.slane %v49_v17, 2  ;;  %v65_v21 = vsel %vm46_vm0, %v64_v18, 0.0 }
  0xa8   :  { %v66_v22 = vrot.slane %v65_v21, 4 }
  0xa9   :  { %v87_v23 = vadd.f32 %v86_v19, %v85_v16  ;;  %v51_v24 = vadd.f32 %v50_v20, %v49_v17 }
  0xaa   :  { %v67_v25 = vadd.f32 %v66_v22, %v65_v21 }
  0xab   :  { %v88_v26 = vrot.slane %v87_v23, 1  ;;  %v52_v27 = vrot.slane %v51_v24, 1 }
  0xac   :  { %v68_v28 = vrot.slane %v67_v25, 2 }
  0xad   :  { %v53_v31 = vadd.f32 %v52_v27, %v51_v24  ;;  %v89_v32 = vadd.f32 %v88_v26, %v87_v23 }
  0xae   :  { %v69_v33 = vadd.f32 %v68_v28, %v67_v25 }
  0xaf   :  { %v56_v34 = vadd.f32 %v55_v29, %v53_v31  ;;  %v92_v35 = vadd.f32 %v91_v30, %v89_v32 }
  0xb0   :  { %v70_v36 = vrot.slane %v69_v33, 1 }
  0xb1   :  { %57 = vst [vmem:[#allocation7] sm:$0x1] %v56_v34  ;;  %93 = vst [vmem:[#allocation7 + $0x2] sm:$0x1] %v92_v35 }
  0xb2   :  { %v71_v38 = vadd.f32 %v70_v36, %v69_v33 }
  0xb4   :  { %v74_v39 = vadd.f32 %v73_v37, %v71_v38 }
  0xb6   :  { %75 = vst [vmem:[#allocation7 + $0x1] sm:$0x1] %v74_v39 }
  0xb7   :  { %165 = shalt.err (!%p162_p1)
}
  0xb8   :  { %s166_s14 = scalar_lea.hbm %s253_s3, 64 }
  0xb9   :  { %p167_p2 = scmp.ne.s32.totalorder %s253_s3, %s166_s14  ;;  %p170_p3 = scmp.lt.u32.totalorder %s166_s14, %s253_s3 }
  0xbb   :  { %p172_p4 = pnand %p170_p3, %p167_p2 }
  0xbd   :  { %175 = shalt.err (!%p172_p4)
}
  0xbe   :  { %103 = dma.vmem_to_hbm [thread:$0]  %s101_s10, 64, %s253_s3, [#allocation4]  }
  0xbf   :  { %180 = dma.done.wait [#allocation4], 64  }
  0xc0   :  { %181 = vsyncadd [#allocation4], 4294967232 }
  0xc1   :  { %107 = vsyncpa [#allocation3], 1 }
  0xc2   :  { %108 = vsyncpa [#allocation4], 1 }
  0xc3   :  { %109 = vsyncpa [#allocation5], 1 }

</bundles_post_ra>
